<compile_context>
chip_gen: v6e
topology: v6e:2x2x1
jax: 0.10.0
libtpu: 0.0.40
codegen_flags: <defaults>
</compile_context>

<pallas_src>
import jax
import jax.numpy as jnp
from jax.experimental import pallas as pl
from jax.experimental.pallas import tpu as pltpu


def add_aux_kernel(x_ref, wcx_ref, bias_ref, o_ref):
    # x_ref: (TS, D), wcx_ref: (D, D), bias_ref: (1, D), o_ref: (TS, D)
    acc = jnp.dot(x_ref[...], wcx_ref[...], preferred_element_type=jnp.float32)
    o_ref[...] = (acc + bias_ref[...]).astype(o_ref.dtype)


def add_aux_forward(x, aux, wp, bp, wc, bc, *, max_rows_per_tile=512):
    """x: (B, S, D), aux: (B, A). wp: (D, A), bp: (D,), wc: (D, 2D), bc: (D,) (torch layout)."""
    B, S, D = x.shape

    # Split `combine` weight into the x-half and aux-half, pre-transposed to (in, out).
    wcx_t = wc[:, :D].T                                   # (D, D)  acts on x
    wca_t = wc[:, D:].T                                   # (D, D)  acts on broadcast aux

    # Fold the aux path into a per-batch bias row (tiny (B, D) computation, done once).
    aux_bias = ((aux @ wp.T + bp) @ wca_t + bc).astype(jnp.float32).reshape(B, 1, D)

    # Row tile: full S when small, otherwise 512-row (multiple of 8) tiles.
    ts = S if S <= max_rows_per_tile else max_rows_per_tile
    grid = (B, pl.cdiv(S, ts))

    # Explicit VMEM budget: double-buffered x/out tiles + resident weight + bias.
    itemsize = x.dtype.itemsize
    vmem_bytes = (2 * ts * D * itemsize                   # x tiles, double-buffered
                  + 2 * ts * D * itemsize                 # out tiles, double-buffered
                  + 2 * D * D * wcx_t.dtype.itemsize      # Wcx^T
                  + 2 * D * 4)                            # bias
    vmem_limit = int(min(max(4 * vmem_bytes, 16 * 2**20), 48 * 2**20))

    grid_spec = pltpu.PrefetchScalarGridSpec(
        num_scalar_prefetch=0,
        grid=grid,
        in_specs=[
            pl.BlockSpec((None, ts, D), lambda b, s: (b, s, 0)),   # x tile -> (ts, D)
            pl.BlockSpec((D, D), lambda b, s: (0, 0)),             # Wcx^T, VMEM-resident
            pl.BlockSpec((None, 1, D), lambda b, s: (b, 0, 0)),    # per-batch bias -> (1, D)
        ],
        out_specs=pl.BlockSpec((None, ts, D), lambda b, s: (b, s, 0)),
    )

    return pl.pallas_call(
        add_aux_kernel,
        out_shape=jax.ShapeDtypeStruct((B, S, D), x.dtype),
        grid_spec=grid_spec,
        compiler_params=pltpu.CompilerParams(
            dimension_semantics=("parallel", "parallel"),
            vmem_limit_bytes=vmem_limit,
        ),
    )(x, wcx_t, aux_bias)


def ref_forward(x, aux, wp, bp, wc, bc):
    """Pure-JAX reference mirroring the PyTorch forward exactly."""
    aux_p = aux @ wp.T + bp                                   # (B, D)
    aux_e = jnp.broadcast_to(aux_p[:, None, :], x.shape)      # expand_as(x)
    cat = jnp.concatenate([x, aux_e], axis=-1)                # (B, S, 2D)
    return cat @ wc.T + bc


if __name__ == "__main__":
    B, S, D, A = 2, 8, 32, 16  # batch, seq, input_dim, aux_dim

    key = jax.random.PRNGKey(0)
    kx, ka, k1, k2, k3, k4 = jax.random.split(key, 6)

    x = jax.random.normal(kx, (B, S, D), dtype=jnp.float32)
    aux = jax.random.normal(ka, (B, A), dtype=jnp.float32)

    # Deterministic parameter init mimicking nn.Linear (U(-1/sqrt(fan_in), 1/sqrt(fan_in))).
    kp = 1.0 / jnp.sqrt(jnp.float32(A))
    kc = 1.0 / jnp.sqrt(jnp.float32(2 * D))
    wp = jax.random.uniform(k1, (D, A), minval=-kp, maxval=kp, dtype=jnp.float32)
    bp = jax.random.uniform(k2, (D,), minval=-kp, maxval=kp, dtype=jnp.float32)
    wc = jax.random.uniform(k3, (D, 2 * D), minval=-kc, maxval=kc, dtype=jnp.float32)
    bc = jax.random.uniform(k4, (D,), minval=-kc, maxval=kc, dtype=jnp.float32)

    out = add_aux_forward(x, aux, wp, bp, wc, bc)
    out = jax.block_until_ready(out)

    ref = ref_forward(x, aux, wp, bp, wc, bc)
    assert out.shape == (B, S, D)
    assert jnp.allclose(out, ref, atol=1e-5, rtol=1e-5), "mismatch vs reference"

    print("KERNEL_OK")
</pallas_src>

<mosaic_0001>
module attributes {stable_mosaic.version = 11 : i64} {
  func.func @add_aux_kernel(%arg0: i32, %arg1: i32, %arg2: memref<1x8x32xf32, #tpu.memory_space<vmem>>, %arg3: memref<32x32xf32, #tpu.memory_space<vmem>>, %arg4: memref<1x1x32xf32, #tpu.memory_space<vmem>>, %arg5: memref<1x8x32xf32, #tpu.memory_space<vmem>>) attributes {dimension_semantics = [#tpu.dimension_semantics<parallel>, #tpu.dimension_semantics<parallel>], iteration_bounds = array<i64: 2, 1>, scalar_prefetch = 0 : i64, scratch_operands = 0 : i64, tpu.core_type = #tpu.core_type<tc>, window_params = [{transform_indices = @transform_0, window_bounds = array<i64: 1, 8, 32>}, {pipeline_mode = #tpu.pipeline_mode<synchronous>, transform_indices = @transform_1, window_bounds = array<i64: 32, 32>}, {transform_indices = @transform_2, window_bounds = array<i64: 1, 1, 32>}, {transform_indices = @transform_3, window_bounds = array<i64: 1, 8, 32>}]} {
    %c0 = arith.constant 0 : index
    %c0_0 = arith.constant 0 : index
    %c0_1 = arith.constant 0 : index
    %0 = vector.load %arg2[%c0, %c0_0, %c0_1] : memref<1x8x32xf32, #tpu.memory_space<vmem>>, vector<1x8x32xf32>
    %1 = vector.shape_cast %0 : vector<1x8x32xf32> to vector<8x32xf32>
    %c0_2 = arith.constant 0 : index
    %c0_3 = arith.constant 0 : index
    %2 = vector.load %arg3[%c0_2, %c0_3] : memref<32x32xf32, #tpu.memory_space<vmem>>, vector<32x32xf32>
    %cst = arith.constant dense<0.000000e+00> : vector<8x32xf32>
    %3 = tpu.matmul %1, %2, %cst {dimension_numbers = #tpu.dot_dimension_numbers<[1], [0], [0], [1], [0, 0, 1, 1], [], []>} : vector<8x32xf32>, vector<32x32xf32>, vector<8x32xf32> -> vector<8x32xf32>
    %c0_4 = arith.constant 0 : index
    %c0_5 = arith.constant 0 : index
    %c0_6 = arith.constant 0 : index
    %4 = vector.load %arg4[%c0_4, %c0_5, %c0_6] : memref<1x1x32xf32, #tpu.memory_space<vmem>>, vector<1x1x32xf32>
    %5 = vector.shape_cast %4 : vector<1x1x32xf32> to vector<1x32xf32>
    %6 = vector.broadcast %5 : vector<1x32xf32> to vector<8x32xf32>
    %7 = arith.addf %3, %6 : vector<8x32xf32>
    %c0_7 = arith.constant 0 : index
    %c0_8 = arith.constant 0 : index
    %c0_9 = arith.constant 0 : index
    %8 = vector.load %arg5[%c0_7, %c0_8, %c0_9] : memref<1x8x32xf32, #tpu.memory_space<vmem>>, vector<1x8x32xf32>
    %9 = vector.shape_cast %8 : vector<1x8x32xf32> to vector<8x32xf32>
    %10 = vector.shape_cast %7 : vector<8x32xf32> to vector<1x8x32xf32>
    tpu.vector_store %arg5[%c0_7, %c0_8, %c0_9], %10 {strides = array<i32>} : memref<1x8x32xf32, #tpu.memory_space<vmem>>, vector<1x8x32xf32>,
    return
  }
  func.func @transform_0(%arg0: i32, %arg1: i32) -> (i32, i32, i32) {
    %c0_i32 = arith.constant 0 : i32
    %c0_i32_0 = arith.constant 0 : i32
    return %arg0, %arg1, %c0_i32 : i32, i32, i32
  }
  func.func @transform_1(%arg0: i32, %arg1: i32) -> (i32, i32) {
    %c0_i32 = arith.constant 0 : i32
    %c0_i32_0 = arith.constant 0 : i32
    %c0_i32_1 = arith.constant 0 : i32
    return %c0_i32, %c0_i32_0 : i32, i32
  }
  func.func @transform_2(%arg0: i32, %arg1: i32) -> (i32, i32, i32) {
    %c0_i32 = arith.constant 0 : i32
    %c0_i32_0 = arith.constant 0 : i32
    %c0_i32_1 = arith.constant 0 : i32
    return %arg0, %c0_i32, %c0_i32_0 : i32, i32, i32
  }
  func.func @transform_3(%arg0: i32, %arg1: i32) -> (i32, i32, i32) {
    %c0_i32 = arith.constant 0 : i32
    %c0_i32_0 = arith.constant 0 : i32
    return %arg0, %arg1, %c0_i32 : i32, i32, i32
  }
}

</mosaic_0001>

<bundles_post_ra>
// kernel: tpu_custom_call.1
= control target key start
LH: loop header
LB: loop body
LE: loop exit
PB: predicated region body
PF: predicated region fallthrough
CT: control target
= control target key end

     0   :  { %8 = vsyncpa [#allocation3], 0  ;;  %s894_s0 = inlined_call_operand.hbm [shape: f32[2,8,32], index: 0, kind: input, shape index: {}]   ;;  %s895_s1 = inlined_call_operand.hbm [shape: f32[32,32], index: 1, kind: input, shape index: {}]   ;;  %s896_s2 = inlined_call_operand.vmem [shape: f32[2,1,32], index: 2, kind: input, shape index: {}]   ;;  %s897_s3 = inlined_call_operand.hbm [shape: f32[2,8,32], index: 3, kind: output, shape index: {}]  }
   0x1   :  { %10 = vsyncpa [#allocation3 + $0x1], 0 }
   0x2   :  { %11 = vsyncpa [#allocation6], 0 }
   0x3   :  { %12 = vsyncpa [#allocation4], 0 }
   0x4   :  { %14 = vsyncpa [#allocation4 + $0x1], 0  ;;  %s710_s12 = smov 0   ;;  %s712_s13 = smov 0  }
   0x5   :  { %s714_s14 = smov 0   ;;  %s716_s15 = smov 0  }
   0x6   :  { %s718_s16 = smov 0   ;;  %s720_s17 = smov 0  }
   0x7 LB: > { %s433_s18 = sadd.s32 4294967295, %s681_s17   ;;  %s434_s19 = sadd.s32 4294967294, %s681_s17   ;;  %s681_s17 = sphi %s720_s17, %s20_s17   ;;  %s677_s16 = sphi %s718_s16, %s915_s16   ;;  %s673_s15 = sphi %s716_s15, %s914_s15   ;;  %s669_s14 = sphi %s714_s14, %s913_s14   ;;  %s665_s13 = sphi %s712_s13, %s912_s13   ;;  %s661_s12 = sphi %s710_s12, %s911_s12  }
   0x8   : > { %p54_p0 = scmp.ne.s32.totalorder %s665_s13, %s661_s12  ;;  %p744_p1 = scmp.eq.s32.totalorder %s433_s18, 0 }
   0x9   : > { %p748_p2 = scmp.eq.s32.totalorder %s433_s18, 1  ;;  %p133_p3 = scmp.eq.s32.totalorder %s434_s19, 1 }
   0xa   : > { %p754_p4 = por %p744_p1, %p54_p0  ;;  %p435_p5 = scmp.ge.s32.totalorder %s681_s17, 1 }
   0xb   : > { %p759_p6 = por %p133_p3, %p54_p0  ;;  %p140_p7 = scmp.lt.s32.totalorder %s681_s17, 3 }
   0xc   : > { %s901_s22 = scalar_select %p754_p4, 1, 0 }
   0xd   : > { %s902_s23 = scalar_select %p759_p6, 1, 0 }
   0xe   : > { %p764_p8 = pnand %p435_p5, %p140_p7  ;;  %s683_s25 = smov [#allocation5]  }
   0xf   : > { %s152_s26 = sshll.u32 %s683_s25, 4  ;;  %s32_s28 = sadd.s32 1, %s677_s16  ;;  %s153_s26 = int_to_ptr.vmem [resolvable:$true] %s152_s26 }
  0x10   : > { %p474_p9 = pneg %p764_p8  ;;  %s554_s29 = scalar_lea.vmem %s153_s26, 512 }
  0x11   : > { %p555_p13 = scmp.ne.s32.totalorder %s153_s26, %s554_s29  ;;  %p562_p5 = scmp.lt.s32.totalorder %s153_s26, %s153_s26 }
  0x12   : > { %p773_p11 = pnand %p474_p9, %p744_p1  ;;  %p563_p7 = scmp.lt.s32.totalorder %s554_s29, %s554_s29 }
  0x14   : > { %p545_p12 = pneg %p773_p11  ;;  %p564_p6 = por %p563_p7, %p562_p5 }
  0x16   : > { %p557_p0 = pnand %p555_p13, %p545_p12 }
  0x18   : > { %p558_p3 = pneg %p557_p0 }
  0x1a   : > { %p565_p4 = pnand %p564_p6, %p558_p3 }
  0x1c   : > { %568 = shalt.err (!%p565_p4)
}
  0x1d   : > { %s684_s30 = smov 128   ;;  %s685_s4 = smov 8  }
  0x1e   : > { %477 = dma.hbm_to_vmem [thread:$0]  (!%p773_p11), %s895_s1, 512, %s153_s26, [#allocation6], %s684_s30, %s684_s30, %s685_s4  }
  0x1f   : > { %p34_p6 = scmp.ge.s32.totalorder %s32_s28, 2  ;;  %s41_s7 = sadd.s32 1, %s669_s14 }
  0x20   : > { %p48_p4 = scmp.ne.s32.totalorder %s669_s14, %s665_s13  ;;  %p49_p9 = scmp.eq.s32.totalorder %s681_s17, 0 }
  0x21   : > { %s917_s28 = smov (%p34_p6, %s32_s28), 0  ;;  %p487_p0 = scmp.lt.s32.totalorder %s681_s17, 2 }
  0x22   : > { %p791_p12 = por %p49_p9, %p48_p4  ;;  %p797_p13 = por %p748_p2, %p48_p4 }
  0x23   : > { %s36_s10 = ssub.s32 %s677_s16, %s917_s28  ;;  %s166_s11 = sand.u32 1, %s669_s14  }
  0x24   : > { %p39_p11 = scmp.eq.s32.totalorder %s36_s10, 0  ;;  %s438_s18 = sshll.u32 %s166_s11, 3 }
  0x25   : > { %s439_s25 = sshll.u32 %s677_s16, 7  ;;  %s170_s30 = scalar_lea.vmem [#allocation2], %s438_s18 }
  0x26   : > { %s806_s19 = scalar_select %p39_p11, %s669_s14, %s41_s7  }
  0x27   : > { %s176_s29 = scalar_lea.hbm %s894_s0, %s439_s25  ;;  %s178_s4 = sshll.u32 %s170_s30, 4  ;;  %s179_s4 = int_to_ptr.vmem [resolvable:$true] %s178_s4 }
  0x28   : > { %p814_p2 = pnand %p487_p0, %p791_p12  ;;  %s167_s5 = scalar_lea.sflag [#allocation3], %s166_s11 }
  0x29   : > { %s582_s6 = scalar_lea.vmem %s179_s4, 128  ;;  %s686_s7 = smov [#allocation2]  }
  0x2a   : > { %p571_p3 = pneg %p814_p2  ;;  %p583_p5 = scmp.ne.s32.totalorder %s179_s4, %s582_s6 }
  0x2b   : > { %s587_s10 = sshll.u32 %s686_s7, 4  ;;  %s588_s10 = int_to_ptr.vmem [resolvable:$false] %s587_s10 }
  0x2c   : > { %p585_p7 = pnand %p583_p5, %p571_p3  ;;  %s589_s25 = scalar_lea.vmem %s588_s10, 256 }
  0x2d   : > { %p590_p4 = scmp.lt.s32.totalorder %s179_s4, %s588_s10  ;;  %p591_p9 = scmp.lt.s32.totalorder %s589_s25, %s582_s6 }
  0x2e   : > { %p586_p6 = pneg %p585_p7 }
  0x2f   : > { %p592_p11 = por %p591_p9, %p590_p4 }
  0x31   : > { %p593_p10 = pnand %p592_p11, %p586_p6 }
  0x33   : > { %596 = shalt.err (!%p593_p10)
}
  0x34   : > { %481 = dma.hbm_to_vmem [thread:$0]  (!%p814_p2), %s176_s29, 128, %s179_s4, %s167_s5  }
  0x35   : > { %193 = sbr.rel (%p764_p8) target bundleno = 278 (0x116), region = 32  ;;  %s825_s8 = sand.u32 (!%p764_p8), 1, %s665_s13  }
  0x36   : > { %s441_s11 = sshll.u32 (!%p764_p8), %s825_s8, 3  ;;  %s196_s18 = scalar_lea.sflag (!%p764_p8), [#allocation3], %s825_s8 }
  0x37   : > { %s199_s26 = scalar_lea.vmem (!%p764_p8), [#allocation2], %s441_s11  ;;  %p908_p12 = scmp.ne.s32.totalorder (!%p764_p8), %s901_s22, 0 }
  0x3a   : > { %648 = dma.done.wait (%p908_p12), %s196_s18, 128  }
  0x3b   : > { %650 = vsyncadd (%p908_p12), %s196_s18, 4294967168 }
  0x3c   : > { %652 = dma.done.wait (%p744_p1), [#allocation6], 512  }
  0x3d   : > { %654 = vsyncadd (%p744_p1), [#allocation6], 4294966784  ;;  %v687_v0 = vmov 0.0   ;;  %vm688_vm0 = vmmov 0   ;;  %v236_v1 = vld [vmem:[#allocation5 + $0x18] sm:$0xff]  ;;  %v235_v2 = vld [vmem:[#allocation5 + $0x10] sm:$0xff] }
  0x3e   : > { %455 = vmatprep.subr.mxu0 %v687_v0  ;;  %463 = vmatprep.mubr.msk.f32.mxu0 %vm688_vm0, %v687_v0  ;;  %v234_v3 = vld [vmem:[#allocation5 + $0x8] sm:$0xff]  ;;  %v233_v4 = vld [vmem:[#allocation5] sm:$0xff]  ;;  %v232_v5 = vld [vmem:[%s199_s26] sm:$0xff]  ;;  %vm244_vm1 = vcmask 261120   ;;  %p229_p1 = scmp.lt.s32.totalorder %s673_s15, 1  ;;  %s447_s29 = sshll.u32 %s673_s15, 7 }
  0x3f   : > { %456 = vmatpush3.msra.mxu0 %v236_v1  ;;  %s228_s30 = scalar_lea.vmem [#allocation7], %s441_s11  ;;  %s851_s6 = scalar_lea.hbm %s897_s3, %s447_s29 }
  0x40   : > { %457 = vmatprep.subr.mxu0 %v687_v0  ;;  %s230_s20 = scalar_select %p229_p1, %s673_s15, 1 }
  0x41   : > { %458 = vmatpush3.msra.mxu0 %v235_v2  ;;  %s334_s4 = sshll.u32 %s228_s30, 4  ;;  %s320_s7 = scalar_lea.sflag [#allocation4], %s825_s8  ;;  %s335_s4 = int_to_ptr.vmem [resolvable:$true] %s334_s4 }
  0x42   : > { %459 = vmatprep.subr.mxu0 %v687_v0  ;;  %s231_s27 = scalar_lea.vmem %s896_s2, %s230_s20  ;;  %s597_s10 = scalar_lea.vmem %s335_s4, 128 }
  0x43   : > { %460 = vmatpush3.msra.mxu0 %v234_v3  ;;  %v444_v6 = vld [vmem:[%s231_s27] ss:$0 sm:$0xff]  ;;  %p598_p8 = scmp.ne.s32.totalorder %s335_s4, %s597_s10  ;;  %s689_s15 = smov [#allocation7]  }
  0x44   : > { %461 = vmatprep.subr.mxu0 %v687_v0  ;;  %s601_s25 = sshll.u32 %s689_s15, 4  ;;  %s602_s25 = int_to_ptr.vmem [resolvable:$false] %s601_s25 }
  0x45   : > { %462 = vmatpush3.msra.mxu0 %v233_v4  ;;  %p599_p10 = pnand %p598_p8, %p797_p13  ;;  %s603_s11 = scalar_lea.vmem %s602_s25, 256 }
  0x46   : > { %464 = vmatmul.mubr.msk.f32.vlgmr.msra.gmra.mxu0 %vm244_vm1, %v232_v5  ;;  %p604_p2 = scmp.lt.s32.totalorder %s335_s4, %s602_s25  ;;  %p605_p3 = scmp.lt.s32.totalorder %s603_s11, %s597_s10 }
  0x47   : > { %p600_p0 = pneg %p599_p10 }
  0x48   : > { %p606_p5 = por %p605_p3, %p604_p2 }
  0x4a   : > { %p607_p7 = pnand %p606_p5, %p600_p0 }
 0x106   : > { %v314_v7 = vpop.f32.mrf.mxu0 }
 0x107   : > { %v315_v8 = vadd.f32 %v444_v6, %v314_v7 }
 0x108   : > { %v465_v9 = vpop.f32.mrf.mxu0 }
 0x109   : > { %318 = vst.msk [vmem:[%s228_s30] sm:$0xff] %vm244_vm1, %v315_v8 }
 0x10a   : > { %610 = shalt.err (!%p607_p7)
}
 0x10b   : > { %s611_s18 = scalar_lea.hbm %s851_s6, 128  ;;  %s615_s20 = scalar_lea.hbm %s897_s3, 256 }
 0x10c   : > { %p612_p6 = scmp.ne.s32.totalorder %s851_s6, %s611_s18  ;;  %p616_p11 = scmp.lt.s32.totalorder %s851_s6, %s897_s3 }
 0x10d   : > { %p617_p12 = scmp.lt.s32.totalorder %s615_s20, %s611_s18 }
 0x10e   : > { %p613_p4 = pnand %p612_p6, %p797_p13 }
 0x10f   : > { %p618_p1 = por %p617_p12, %p616_p11 }
 0x110   : > { %p614_p9 = pneg %p613_p4 }
 0x112   : > { %p619_p8 = pnand %p618_p1, %p614_p9 }
 0x114   : > { %622 = shalt.err (!%p619_p8)
}
 0x115   : > { %472 = dma.vmem_to_hbm [thread:$0]  (%p797_p13), %s335_s4, 128, %s851_s6, %s320_s7  }
 0x116 PF: > { %s346_s27 = sand.u32 1, %s661_s12   ;;  %p909_p10 = scmp.ne.s32.totalorder %s902_s23, 0 }
 0x117   : > { %p910_p0 = scmp.ge.s32.totalorder %s681_s17, 2  ;;  %s347_s29 = scalar_lea.sflag [#allocation4], %s346_s27 }
 0x119   : > { %p483_p2 = pnand %p910_p0, %p909_p10 }
 0x11b   : > { %p484_p3 = pneg %p483_p2 }
 0x11d   : > { %656 = dma.done.wait (%p484_p3), %s347_s29, 128  }
 0x11e   : > { %658 = vsyncadd (%p484_p3), %s347_s29, 4294967168  ;;  %s20_s17 = sadd.s32 1, %s681_s17   ;;  %s911_s12 = smov %s665_s13 }
 0x11f   : > { %p17_p5 = scmp.ge.s32.totalorder %s20_s17, 4   ;;  %s912_s13 = smov %s669_s14 }
 0x120   : > { %s913_s14 = smov %s806_s19  ;;  %s914_s15 = smov %s677_s16 }
 0x121   : > { %s915_s16 = smov %s917_s28  ;;  %19 = sbr.rel (!%p17_p5) target bundleno = 7 (0x7), region = 84 }
 0x126   :  { %352 = vsyncpa [#allocation3], 1 }
 0x127   :  { %354 = vsyncpa [#allocation3 + $0x1], 1 }
 0x128   :  { %355 = vsyncpa [#allocation6], 1 }
 0x129   :  { %356 = vsyncpa [#allocation4], 1 }
 0x12a   :  { %358 = vsyncpa [#allocation4 + $0x1], 1 }

</bundles_post_ra>
